<compile_context>
chip_gen: v6e
topology: v6e:2x2x1
jax: 0.10.0
libtpu: 0.0.40
codegen_flags: <defaults>
</compile_context>

<pallas_src>
import functools

import jax
import jax.numpy as jnp
from jax import lax
from jax.experimental import pallas as pl
from jax.experimental.pallas import tpu as pltpu


_TARGET_BLOCK_BYTES = 1 << 20          # ~1 MiB of input per grid step (~85% roofline)
_VMEM_LIMIT_BYTES = 32 * 1024 * 1024   # explicit scoped-VMEM limit (safe on v5e/v6e/v7x)


def _round_up(x, m):
    return ((x + m - 1) // m) * m


def _round_down(x, m):
    return (x // m) * m


def _pick_block_rows(total_rows, row_width, itemsize):
    """Rows per block: ~_TARGET_BLOCK_BYTES of input, multiple of 8, <= padded total."""
    rows = _round_down(max(_TARGET_BLOCK_BYTES // max(row_width * itemsize, 1), 8), 8)
    rows = max(8, rows)
    return min(rows, _round_up(total_rows, 8))


def _cross_entropy_mean(outputs, targets):
    """mean_n [ logsumexp(outputs[n]) - outputs[n, targets[n]] ] via per-block partials."""
    N, C = outputs.shape
    bn = _pick_block_rows(N, C, outputs.dtype.itemsize)
    grid_n = pl.cdiv(N, bn)
    labels = targets.astype(jnp.int32).reshape(N, 1)

    def ce_kernel(out_ref, lab_ref, psum_ref):
        i = pl.program_id(0)
        logits = out_ref[...].astype(jnp.float32)                  # (bn, C) lane-dense
        lab = lab_ref[...]                                         # (bn, 1) int32
        m = jnp.max(logits, axis=-1, keepdims=True)
        lse = m + jnp.log(jnp.sum(jnp.exp(logits - m), axis=-1, keepdims=True))
        cls_idx = lax.broadcasted_iota(jnp.int32, logits.shape, 1)  # hoisted once per block
        picked = jnp.sum(jnp.where(cls_idx == lab, logits, jnp.float32(0.0)),
                         axis=-1, keepdims=True)                   # one-hot label pick
        per_row = lse - picked                                     # (bn, 1)
        # Mask ragged tail rows of the last block before the block-level sum.
        row = i * bn + lax.broadcasted_iota(jnp.int32, (bn, 1), 0)
        block_sum = jnp.sum(jnp.where(row < N, per_row, jnp.float32(0.0)))
        # One aligned (8,128) tile per block: unmasked store, ~4 KiB writeback.
        psum_ref[...] = jnp.full((1, 8, 128), block_sum, jnp.float32)

    cost = pl.CostEstimate(
        flops=6 * N * C,
        transcendentals=N * C + N,
        bytes_accessed=N * C * outputs.dtype.itemsize + N * 4 + grid_n * 8 * 128 * 4,
    )
    partials = pl.pallas_call(
        ce_kernel,
        out_shape=jax.ShapeDtypeStruct((grid_n, 8, 128), jnp.float32),
        grid=(grid_n,),
        in_specs=[
            pl.BlockSpec((bn, C), lambda i: (i, 0)),   # logits block, C on lanes
            pl.BlockSpec((bn, 1), lambda i: (i, 0)),   # labels column
        ],
        out_specs=pl.BlockSpec((1, 8, 128), lambda i: (i, 0, 0)),
        compiler_params=pltpu.CompilerParams(
            dimension_semantics=("parallel",),
            vmem_limit_bytes=_VMEM_LIMIT_BYTES,
        ),
        cost_estimate=cost,
    )(outputs, labels)
    return jnp.sum(partials[:, 0, 0]) / jnp.float32(N)


def _entropy_per_leading(dist):
    """sum(-p*log p over last two dims)/M for every leading index of dist (..., M, K)."""
    M, K = dist.shape[-2], dist.shape[-1]
    lead_shape = dist.shape[:-2]
    L = 1
    for d in lead_shape:
        L *= d
    dist3 = dist.reshape(L, M, K)            # contiguous reshape: no copy
    bm = _pick_block_rows(M, K, dist.dtype.itemsize)
    grid_m = pl.cdiv(M, bm)

    def entr_kernel(dist_ref, psum_ref):
        j = pl.program_id(1)
        p = dist_ref[0].astype(jnp.float32) + jnp.float32(1e-7)    # (bm, K) lane-dense
        ent = jnp.sum(-p * jnp.log(p), axis=-1, keepdims=True)     # (bm, 1)
        row = j * bm + lax.broadcasted_iota(jnp.int32, (bm, 1), 0)
        block_sum = jnp.sum(jnp.where(row < M, ent, jnp.float32(0.0)))
        psum_ref[...] = jnp.full((1, 1, 8, 128), block_sum, jnp.float32)

    cost = pl.CostEstimate(
        flops=3 * L * M * K,
        transcendentals=L * M * K,
        bytes_accessed=L * M * K * dist.dtype.itemsize + L * grid_m * 8 * 128 * 4,
    )
    partials = pl.pallas_call(
        entr_kernel,
        out_shape=jax.ShapeDtypeStruct((L, grid_m, 8, 128), jnp.float32),
        grid=(L, grid_m),
        in_specs=[pl.BlockSpec((1, bm, K), lambda l, j: (l, j, 0))],
        out_specs=pl.BlockSpec((1, 1, 8, 128), lambda l, j: (l, j, 0, 0)),
        compiler_params=pltpu.CompilerParams(
            dimension_semantics=("parallel", "parallel"),
            vmem_limit_bytes=_VMEM_LIMIT_BYTES,
        ),
        cost_estimate=cost,
    )(dist3)
    per_l = jnp.sum(partials[:, :, 0, 0], axis=1) / jnp.float32(M)   # (L,)
    if len(lead_shape) == 0:
        return per_l[0]                       # 2-D dist: scalar entropy (torch semantics)
    return per_l.reshape(lead_shape)          # >2-D dist: per-leading-dim entropy vector


@jax.jit
def rib_loss_pallas(dist, outputs, targets, lam):
    """Pallas implementation of RIBLoss.forward -> (loss, loss_cross, loss_entr)."""
    loss_cross = _cross_entropy_mean(outputs, targets)
    loss_entr = _entropy_per_leading(dist)
    loss = loss_cross - lam * loss_entr
    return loss, loss_cross, loss_entr


def rib_loss_ref(dist, outputs, targets, lam):
    """Pure-JAX reference for correctness checking."""
    lse = jax.nn.logsumexp(outputs, axis=-1)
    picked = jnp.take_along_axis(outputs, targets[:, None], axis=-1)[:, 0]
    loss_cross = jnp.mean(lse - picked)
    p = dist + 1e-7
    loss_entr = jnp.sum(jnp.sum(-p * jnp.log(p), axis=-1), axis=-1) / dist.shape[-2]
    loss = loss_cross - lam * loss_entr
    return loss, loss_cross, loss_entr


if __name__ == "__main__":
    # Small deterministic setup consistent with the module:
    #   outputs (N, C) logits, targets (N,) class ids, dist (M, K) distribution rows.
    N, C = 16, 10
    M, K = 8, 32
    lam = 0.5

    key = jax.random.PRNGKey(0)
    k_out, k_tgt, k_dst, k_dstb = jax.random.split(key, 4)
    outputs = jax.random.normal(k_out, (N, C), jnp.float32)
    targets = jax.random.randint(k_tgt, (N,), 0, C, jnp.int32)
    dist = jax.nn.softmax(jax.random.normal(k_dst, (M, K), jnp.float32), axis=-1)

    loss, loss_cross, loss_entr = rib_loss_pallas(dist, outputs, targets, lam)
    loss = jax.block_until_ready(loss)

    ref_loss, ref_cross, ref_entr = rib_loss_ref(dist, outputs, targets, lam)
    assert jnp.allclose(loss_cross, ref_cross, rtol=1e-5, atol=1e-6), (loss_cross, ref_cross)
    assert jnp.allclose(loss_entr, ref_entr, rtol=1e-5, atol=1e-6), (loss_entr, ref_entr)
    assert jnp.allclose(loss, ref_loss, rtol=1e-5, atol=1e-6), (loss, ref_loss)

    # Batched (>2-D) dist case: per-leading-dim entropy vector, as in the torch spec.
    dist_b = jax.nn.softmax(jax.random.normal(k_dstb, (2, M, K), jnp.float32), axis=-1)
    loss_b, cross_b, entr_b = rib_loss_pallas(dist_b, outputs, targets, lam)
    loss_b = jax.block_until_ready(loss_b)
    ref_loss_b, ref_cross_b, ref_entr_b = rib_loss_ref(dist_b, outputs, targets, lam)
    assert jnp.allclose(cross_b, ref_cross_b, rtol=1e-5, atol=1e-6), (cross_b, ref_cross_b)
    assert jnp.allclose(entr_b, ref_entr_b, rtol=1e-5, atol=1e-6), (entr_b, ref_entr_b)
    assert jnp.allclose(loss_b, ref_loss_b, rtol=1e-5, atol=1e-6), (loss_b, ref_loss_b)

    print("KERNEL_OK")
</pallas_src>

<mosaic_0001>
module attributes {stable_mosaic.version = 11 : i64} {
  func.func @ce_kernel(%arg0: i32, %arg1: memref<16x10xf32, #tpu.memory_space<vmem>>, %arg2: memref<16x1xi32, #tpu.memory_space<vmem>>, %arg3: memref<1x8x128xf32, #tpu.memory_space<vmem>>) attributes {dimension_semantics = [#tpu.dimension_semantics<parallel>], iteration_bounds = array<i64: 1>, scalar_prefetch = 0 : i64, scratch_operands = 0 : i64, tpu.core_type = #tpu.core_type<tc>, window_params = [{transform_indices = @transform_0, window_bounds = array<i64: 16, 10>}, {transform_indices = @transform_1, window_bounds = array<i64: 16, 1>}, {transform_indices = @transform_2, window_bounds = array<i64: 1, 8, 128>}]} {
    %c0 = arith.constant 0 : index
    %c0_0 = arith.constant 0 : index
    %0 = vector.load %arg1[%c0, %c0_0] : memref<16x10xf32, #tpu.memory_space<vmem>>, vector<16x10xf32>
    %c0_1 = arith.constant 0 : index
    %c0_2 = arith.constant 0 : index
    %1 = vector.load %arg2[%c0_1, %c0_2] : memref<16x1xi32, #tpu.memory_space<vmem>>, vector<16x1xi32>
    %cst = arith.constant dense<0xFF800000> : vector<16xf32>
    %2 = vector.multi_reduction <maximumf>, %0, %cst [1] : vector<16x10xf32> to vector<16xf32>
    %3 = vector.shape_cast %2 : vector<16xf32> to vector<16x1xf32>
    %4 = vector.broadcast %3 : vector<16x1xf32> to vector<16x10xf32>
    %5 = arith.subf %0, %4 : vector<16x10xf32>
    %6 = math.exp %5 : vector<16x10xf32>
    %cst_3 = arith.constant dense<0.000000e+00> : vector<16xf32>
    %7 = vector.multi_reduction <add>, %6, %cst_3 [1] : vector<16x10xf32> to vector<16xf32>
    %8 = vector.shape_cast %7 : vector<16xf32> to vector<16x1xf32>
    %9 = math.log %8 : vector<16x1xf32>
    %10 = arith.addf %3, %9 : vector<16x1xf32>
    %11 = tpu.iota {dimensions = array<i32: 1>} : vector<16x10xi32>
    %12 = vector.broadcast %1 : vector<16x1xi32> to vector<16x10xi32>
    %13 = arith.cmpi eq, %11, %12 : vector<16x10xi32>
    %cst_4 = arith.constant 0.000000e+00 : f32
    %14 = vector.broadcast %cst_4 : f32 to vector<16x10xf32>
    %15 = arith.select %13, %0, %14 : vector<16x10xi1>, vector<16x10xf32>
    %cst_5 = arith.constant dense<0.000000e+00> : vector<16xf32>
    %16 = vector.multi_reduction <add>, %15, %cst_5 [1] : vector<16x10xf32> to vector<16xf32>
    %17 = vector.shape_cast %16 : vector<16xf32> to vector<16x1xf32>
    %18 = arith.subf %10, %17 : vector<16x1xf32>
    %c16_i32 = arith.constant 16 : i32
    %19 = arith.muli %arg0, %c16_i32 : i32
    %20 = tpu.iota {dimensions = array<i32: 0>} : vector<16x1xi32>
    %21 = vector.broadcast %19 : i32 to vector<16x1xi32>
    %22 = arith.addi %21, %20 : vector<16x1xi32>
    %c16_i32_6 = arith.constant 16 : i32
    %23 = vector.broadcast %c16_i32_6 : i32 to vector<16x1xi32>
    %24 = arith.cmpi slt, %22, %23 : vector<16x1xi32>
    %cst_7 = arith.constant 0.000000e+00 : f32
    %25 = vector.broadcast %cst_7 : f32 to vector<16x1xf32>
    %26 = arith.select %24, %18, %25 : vector<16x1xi1>, vector<16x1xf32>
    %27 = vector.shape_cast %26 : vector<16x1xf32> to vector<1x16x1xf32>
    %cst_8 = arith.constant dense<0.000000e+00> : vector<1xf32>
    %28 = vector.multi_reduction <add>, %27, %cst_8 [1, 2] : vector<1x16x1xf32> to vector<1xf32>
    %29 = vector.shape_cast %28 : vector<1xf32> to vector<1x1x1xf32>
    %30 = vector.extract %29[0, 0, 0] : f32 from vector<1x1x1xf32>
    %31 = vector.broadcast %30 : f32 to vector<1x8x128xf32>
    %c0_9 = arith.constant 0 : index
    %c0_10 = arith.constant 0 : index
    %c0_11 = arith.constant 0 : index
    %32 = vector.load %arg3[%c0_9, %c0_10, %c0_11] : memref<1x8x128xf32, #tpu.memory_space<vmem>>, vector<1x8x128xf32>
    tpu.vector_store %arg3[%c0_9, %c0_10, %c0_11], %31 {strides = array<i32>} : memref<1x8x128xf32, #tpu.memory_space<vmem>>, vector<1x8x128xf32>,
    return
  }
  func.func @transform_0(%arg0: i32) -> (i32, i32) {
    %c0_i32 = arith.constant 0 : i32
    %c0_i32_0 = arith.constant 0 : i32
    return %arg0, %c0_i32 : i32, i32
  }
  func.func @transform_1(%arg0: i32) -> (i32, i32) {
    %c0_i32 = arith.constant 0 : i32
    %c0_i32_0 = arith.constant 0 : i32
    return %arg0, %c0_i32 : i32, i32
  }
  func.func @transform_2(%arg0: i32) -> (i32, i32, i32) {
    %c0_i32 = arith.constant 0 : i32
    %c0_i32_0 = arith.constant 0 : i32
    %c0_i32_1 = arith.constant 0 : i32
    return %arg0, %c0_i32, %c0_i32_0 : i32, i32, i32
  }
}

module attributes {stable_mosaic.version = 11 : i64} {
  func.func @entr_kernel(%arg0: i32, %arg1: i32, %arg2: memref<1x8x32xf32, #tpu.memory_space<vmem>>, %arg3: memref<1x1x8x128xf32, #tpu.memory_space<vmem>>) attributes {dimension_semantics = [#tpu.dimension_semantics<parallel>, #tpu.dimension_semantics<parallel>], iteration_bounds = array<i64: 1, 1>, scalar_prefetch = 0 : i64, scratch_operands = 0 : i64, tpu.core_type = #tpu.core_type<tc>, window_params = [{transform_indices = @transform_0, window_bounds = array<i64: 1, 8, 32>}, {transform_indices = @transform_1, window_bounds = array<i64: 1, 1, 8, 128>}]} {
    %c0 = arith.constant 0 : index
    %c0_0 = arith.constant 0 : index
    %c0_1 = arith.constant 0 : index
    %0 = vector.load %arg2[%c0, %c0_0, %c0_1] : memref<1x8x32xf32, #tpu.memory_space<vmem>>, vector<1x8x32xf32>
    %1 = vector.shape_cast %0 : vector<1x8x32xf32> to vector<8x32xf32>
    %cst = arith.constant 1.000000e-07 : f32
    %2 = vector.broadcast %cst : f32 to vector<8x32xf32>
    %3 = arith.addf %1, %2 : vector<8x32xf32>
    %cst_2 = arith.constant 0.000000e+00 : f32
    %4 = vector.broadcast %cst_2 : f32 to vector<8x32xf32>
    %5 = arith.subf %4, %3 : vector<8x32xf32>
    %6 = math.log %3 : vector<8x32xf32>
    %7 = arith.mulf %5, %6 : vector<8x32xf32>
    %cst_3 = arith.constant dense<0.000000e+00> : vector<8xf32>
    %8 = vector.multi_reduction <add>, %7, %cst_3 [1] : vector<8x32xf32> to vector<8xf32>
    %9 = vector.shape_cast %8 : vector<8xf32> to vector<8x1xf32>
    %c8_i32 = arith.constant 8 : i32
    %10 = arith.muli %arg1, %c8_i32 : i32
    %11 = tpu.iota {dimensions = array<i32: 0>} : vector<8x1xi32>
    %12 = vector.broadcast %10 : i32 to vector<8x1xi32>
    %13 = arith.addi %12, %11 : vector<8x1xi32>
    %c8_i32_4 = arith.constant 8 : i32
    %14 = vector.broadcast %c8_i32_4 : i32 to vector<8x1xi32>
    %15 = arith.cmpi slt, %13, %14 : vector<8x1xi32>
    %cst_5 = arith.constant 0.000000e+00 : f32
    %16 = vector.broadcast %cst_5 : f32 to vector<8x1xf32>
    %17 = arith.select %15, %9, %16 : vector<8x1xi1>, vector<8x1xf32>
    %18 = vector.shape_cast %17 : vector<8x1xf32> to vector<1x8x1xf32>
    %cst_6 = arith.constant dense<0.000000e+00> : vector<1xf32>
    %19 = vector.multi_reduction <add>, %18, %cst_6 [1, 2] : vector<1x8x1xf32> to vector<1xf32>
    %20 = vector.shape_cast %19 : vector<1xf32> to vector<1x1x1xf32>
    %21 = vector.extract %20[0, 0, 0] : f32 from vector<1x1x1xf32>
    %22 = vector.broadcast %21 : f32 to vector<1x1x8x128xf32>
    %c0_7 = arith.constant 0 : index
    %c0_8 = arith.constant 0 : index
    %c0_9 = arith.constant 0 : index
    %c0_10 = arith.constant 0 : index
    %23 = vector.load %arg3[%c0_7, %c0_8, %c0_9, %c0_10] : memref<1x1x8x128xf32, #tpu.memory_space<vmem>>, vector<1x1x8x128xf32>
    tpu.vector_store %arg3[%c0_7, %c0_8, %c0_9, %c0_10], %22 {strides = array<i32>} : memref<1x1x8x128xf32, #tpu.memory_space<vmem>>, vector<1x1x8x128xf32>,
    return
  }
  func.func @transform_0(%arg0: i32, %arg1: i32) -> (i32, i32, i32) {
    %c0_i32 = arith.constant 0 : i32
    %c0_i32_0 = arith.constant 0 : i32
    return %arg0, %arg1, %c0_i32 : i32, i32, i32
  }
  func.func @transform_1(%arg0: i32, %arg1: i32) -> (i32, i32, i32, i32) {
    %c0_i32 = arith.constant 0 : i32
    %c0_i32_0 = arith.constant 0 : i32
    %c0_i32_1 = arith.constant 0 : i32
    return %arg0, %arg1, %c0_i32, %c0_i32_0 : i32, i32, i32, i32
  }
}

</mosaic_0001>

<bundles_post_ra>
// kernel: rib_loss_pallas.3
= control target key start
LH: loop header
LB: loop body
LE: loop exit
PB: predicated region body
PF: predicated region fallthrough
CT: control target
= control target key end

     0   :  { %vm14_vm0 = vcmask 261120   ;;  %vm25_vm1 = vcmask 7168   ;;  %s62_s0 = inlined_call_operand.vmem [shape: f32[1,8,32], index: 0, kind: input, shape index: {}]   ;;  %s63_s1 = inlined_call_operand.vmem [shape: f32[1,1,8,128], index: 1, kind: output, shape index: {}]  }
   0x1   :  { %v8_v0 = vld [vmem:[%s62_s0] sm:$0xff] }
   0x2   :  { %v9_v1 = vadd.f32 1e-07, %v8_v0 }
   0x4   :  { %44 = vlog2.f32 %v9_v1  ;;  %v10_v2 = vsub.f32 0.0, %v9_v1 }
  0x11   :  { %v45_v3 = vpop.eup %44 }
  0x12   :  { %v12_v4 = vmul.f32 0.6931472, %v45_v3 }
  0x14   :  { %v13_v5 = vmul.f32 %v12_v4, %v10_v2 }
  0x16   :  { %v15_v6 = vsel %vm14_vm0, %v13_v5, 0.0 }
  0x17   :  { %16 = vadd.xlane.f32.xlu0 %v15_v6 }
  0xa0   :  { %v17_v7 = vpop.xlane.xlu0 %16 }
  0xa1   :  { %v26_v8 = vsel %vm25_vm1, %v17_v7, 0.0 }
  0xa2   :  { %27 = vadd.xlane.f32.xlu0 %v26_v8 }
 0x12b   :  { %v28_v9 = vpop.xlane.xlu0 %27 }
 0x12c   :  { %v29_v10 = vrot.slane %v28_v9, 4 }
 0x12e   :  { %v30_v11 = vadd.f32 %v29_v10, %v28_v9 }
 0x130   :  { %v31_v12 = vrot.slane %v30_v11, 2 }
 0x132   :  { %v32_v13 = vadd.f32 %v31_v12, %v30_v11 }
 0x134   :  { %v33_v14 = vrot.slane %v32_v13, 1 }
 0x136   :  { %v34_v15 = vadd.f32 %v33_v14, %v32_v13 }
 0x138   :  { %42 = vpush %v34_v15 }
 0x169   :  { %s43_s0 = spop %42 }
 0x16a   :  { %v36_v16 = vstv %s43_s0 }
 0x16b   :  { %37 = vst [vmem:[%s63_s1] sm:$0xff] %v36_v16 }

// kernel: rib_loss_pallas.2
= control target key start
LH: loop header
LB: loop body
LE: loop exit
PB: predicated region body
PF: predicated region fallthrough
CT: control target
= control target key end

     0   :  { %vm15_vm0 = vcmask 80896   ;;  %v103_v2 = vmov 0   ;;  %v40_v13 = vlaneseq  ;;  %vm71_vm3 = vcmask 7168   ;;  %s140_s0 = inlined_call_operand.vmem [shape: f32[16,10], index: 0, kind: input, shape index: {}]   ;;  %s141_s1 = inlined_call_operand.vmem [shape: s32[16,1], index: 1, kind: input, shape index: {}]   ;;  %s142_s2 = inlined_call_operand.vmem [shape: f32[1,8,128], index: 2, kind: output, shape index: {}]  }
   0x1   :  { %v11_v0 = vld [vmem:[%s140_s0] sm:$0xff]  ;;  %v12_v1 = vld [vmem:[%s140_s0 + $0x8] sm:$0xff]  ;;  %93 = vset.pattern.permute.xlu1 %v103_v2  ;;  %94 = vset.pattern.permute.xlu0 %v103_v2 }
   0x2   :  { %v13_v3 = vld [vmem:[%s141_s1] sm:$0xff]  ;;  %v16_v4 = vsel %vm15_vm0, %v11_v0, -inf  ;;  %v14_v5 = vld [vmem:[%s141_s1 + $0x8] sm:$0xff]  ;;  %v19_v6 = vsel %vm15_vm0, %v12_v1, -inf  ;;  %v41_v15 = vand.u32 127, %v40_v13 }
   0x3   :  { %43 = vperm.xlu1 %93, %v13_v3   ;;  %17 = vmax.xlane.f32.xlu0 %v16_v4 }
   0x7   :  { %46 = vperm.xlu1 %93, %v14_v5   ;;  %20 = vmax.xlane.f32.xlu0 %v19_v6 }
  0x7e   :  { %v44_v14 = vpop.permute.xlu1 %43 }
  0x7f   :  { %vm48_vm1 = vcmp.eq.s32.totalorder %v41_v15, %v44_v14 }
  0x80   :  { %v50_v18 = vsel %vm48_vm1, %v11_v0, 0.0 }
  0x81   :  { %v52_v20 = vsel %vm15_vm0, %v50_v18, 0.0 }
  0x82   :  { %v47_v16 = vpop.permute.xlu1 %46 }
  0x83   :  { %vm49_vm2 = vcmp.eq.s32.totalorder %v41_v15, %v47_v16 }
  0x84   :  { %v51_v22 = vsel %vm49_vm2, %v12_v1, 0.0 }
  0x85   :  { %v55_v24 = vsel %vm15_vm0, %v51_v22, 0.0 }
  0x8c   :  { %v18_v7 = vpop.xlane.xlu0 %17 }
  0x8d   :  { %v22_v8 = vsub.f32 %v11_v0, %v18_v7 }
  0x8f   :  { %v24_v9 = vmul.f32 1.442695, %v22_v8 }
  0x90   :  { %v21_v10 = vpop.xlane.xlu0 %20 }
  0x91   :  { %95 = vpow2.f32 %v24_v9  ;;  %v23_v11 = vsub.f32 %v12_v1, %v21_v10 }
  0x93   :  { %v26_v12 = vmul.f32 1.442695, %v23_v11 }
  0x95   :  { %97 = vpow2.f32 %v26_v12 }
  0x9e   :  { %v96_v17 = vpop.eup %95 }
  0x9f   :  { %v28_v19 = vsel %vm15_vm0, %v96_v17, 0.0 }
  0xa0   :  { %29 = vadd.xlane.f32.xlu0 %v28_v19 }
  0xa2   :  { %v98_v21 = vpop.eup %97 }
  0xa3   :  { %v31_v23 = vsel %vm15_vm0, %v98_v21, 0.0 }
  0xa4   :  { %32 = vadd.xlane.f32.xlu1 %v31_v23  ;;  %53 = vadd.xlane.f32.xlu0 %v52_v20 }
  0xa8   :  { %56 = vadd.xlane.f32.xlu0 %v55_v24 }
 0x129   :  { %v30_v25 = vpop.xlane.xlu0 %29 }
 0x12a   :  { %99 = vlog2.f32 %v30_v25 }
 0x12d   :  { %v33_v26 = vpop.xlane.xlu1 %32  ;;  %v54_v29 = vpop.xlane.xlu0 %53 }
 0x12e   :  { %101 = vlog2.f32 %v33_v26 }
 0x131   :  { %v57_v35 = vpop.xlane.xlu0 %56 }
 0x137   :  { %v100_v27 = vpop.eup %99 }
 0x138   :  { %v35_v28 = vmul.f32 0.6931472, %v100_v27 }
 0x13a   :  { %v38_v30 = vadd.f32 %v35_v28, %v18_v7 }
 0x13b   :  { %v102_v31 = vpop.eup %101 }
 0x13c   :  { %v37_v32 = vmul.f32 0.6931472, %v102_v31  ;;  %v58_v33 = vsub.f32 %v38_v30, %v54_v29 }
 0x13e   :  { %v39_v34 = vadd.f32 %v37_v32, %v21_v10  ;;  %v72_v37 = vsel %vm71_vm3, %v58_v33, 0.0 }
 0x140   :  { %v59_v36 = vsub.f32 %v39_v34, %v57_v35 }
 0x142   :  { %v73_v38 = vsel %vm71_vm3, %v59_v36, 0.0 }
 0x143   :  { %v74_v39 = vadd.f32 %v73_v38, %v72_v37 }
 0x145   :  { %75 = vadd.xlane.f32.xlu0 %v74_v39 }
 0x1ce   :  { %v76_v40 = vpop.xlane.xlu0 %75 }
 0x1cf   :  { %v77_v41 = vrot.slane %v76_v40, 4 }
 0x1d1   :  { %v78_v42 = vadd.f32 %v77_v41, %v76_v40 }
 0x1d3   :  { %v79_v43 = vrot.slane %v78_v42, 2 }
 0x1d5   :  { %v80_v44 = vadd.f32 %v79_v43, %v78_v42 }
 0x1d7   :  { %v81_v45 = vrot.slane %v80_v44, 1 }
 0x1d9   :  { %v82_v46 = vadd.f32 %v81_v45, %v80_v44 }
 0x1db   :  { %90 = vpush %v82_v46 }
 0x20c   :  { %s91_s0 = spop %90 }
 0x20d   :  { %v84_v47 = vstv %s91_s0 }
 0x20e   :  { %85 = vst [vmem:[%s142_s2] sm:$0xff] %v84_v47 }

</bundles_post_ra>
